<compile_context>
chip_gen: v7x
topology: tpu7x:2x2x1
jax: 0.10.0
libtpu: 0.0.40
codegen_flags: <defaults>
</compile_context>

<pallas_src>
import jax
import jax.numpy as jnp
from jax.experimental import pallas as pl
from jax.experimental.pallas import tpu as pltpu

BN_EPS = 1e-5
_SQRT2 = 1.4142135623730951
MATMUL_DTYPE = jnp.bfloat16   # MXU inputs + inter-pass activation storage; accumulation stays f32


def _round_up(v, m):
    return (v + m - 1) // m * m


def _pad2d(a, rows, cols):
    pr, pc = rows - a.shape[0], cols - a.shape[1]
    if pr or pc:
        a = jnp.pad(a, ((0, pr), (0, pc)))
    return a


def _gelu_exact(x):
    # nn.GELU() default: 0.5 * x * (1 + erf(x / sqrt(2)))
    return 0.5 * x * (1.0 + jax.lax.erf(x / _SQRT2))


def _vmem_limit_bytes():
    # Size the scoped VMEM limit per chip generation (~85% of physical):
    #   v5e/v6e (128 MiB) -> ~108 MiB, v7x (64 MiB) -> ~54 MiB.
    try:
        cap = pltpu.get_tpu_info().vmem_capacity_bytes
    except Exception:
        cap = 64 * 1024 * 1024
    return max(32 * 1024 * 1024, int(cap * 0.85))


def _choose_tm(n):
    if n >= 1024:
        return 512            # bigger row tiles -> closer to HBM roofline (v5e/v6e have the VMEM)
    if n >= 512:
        return 256
    if n >= 16:
        # keep at least 2 row tiles so the "parallel" axis can split across v7x's 2 TensorCores
        return _round_up(-(-n // 2), 8)
    return _round_up(n, 8)


# ----------------------------- kernels -------------------------------------------------

def _matmul_stats_kernel(x_ref, w_ref, p_ref, sum_ref, sumsq_ref):
    # p = x @ W on the MXU (bf16 inputs, f32 accumulation); per-tile BN partial sums from
    # the f32 accumulator, activation stored back as bf16.
    p = jnp.dot(x_ref[...], w_ref[...], preferred_element_type=jnp.float32)
    p_ref[...] = p.astype(p_ref.dtype)
    sum_ref[...] = jnp.sum(p, axis=0, keepdims=True)[None]        # (1, 1, F)
    sumsq_ref[...] = jnp.sum(p * p, axis=0, keepdims=True)[None]  # (1, 1, F)


def _make_bn_gelu_matmul_stats_kernel(tm, n_true, need_mask):
    def kernel(p_ref, scale_ref, shift_ref, w_ref, q_ref, sum_ref, sumsq_ref):
        # BN as one fused multiply-add with precomputed scale/shift, then exact GELU.
        h = p_ref[...].astype(jnp.float32)
        a = _gelu_exact(h * scale_ref[...] + shift_ref[...])
        if need_mask:
            # Zero padded batch rows so they contribute nothing to layer-2 BN stats.
            row = pl.program_id(0) * tm + jax.lax.broadcasted_iota(jnp.int32, (tm, 1), 0)
            a = jnp.where(row < n_true, a, 0.0)
        q = jnp.dot(a.astype(MATMUL_DTYPE), w_ref[...], preferred_element_type=jnp.float32)
        q_ref[...] = q.astype(q_ref.dtype)
        sum_ref[...] = jnp.sum(q, axis=0, keepdims=True)[None]
        sumsq_ref[...] = jnp.sum(q * q, axis=0, keepdims=True)[None]
    return kernel


def _bn_gelu_kernel(q_ref, scale_ref, shift_ref, o_ref):
    y = _gelu_exact(q_ref[...].astype(jnp.float32) * scale_ref[...] + shift_ref[...])
    o_ref[...] = y.astype(o_ref.dtype)


# ----------------------------- host-side BN stat reduction -----------------------------

def _bn_scale_shift(part_sum, part_sumsq, gamma_p, beta_p, n_true):
    # part_sum / part_sumsq: (n_tiles, 1, F) partial reductions from the kernels.
    s = jnp.sum(part_sum[:, 0, :], axis=0)
    ss = jnp.sum(part_sumsq[:, 0, :], axis=0)
    mean = s / n_true
    var = jnp.maximum(ss / n_true - mean * mean, 0.0)  # biased var; guard cancellation
    inv = jax.lax.rsqrt(var + BN_EPS)
    scale = gamma_p * inv
    shift = beta_p - mean * scale
    return scale.reshape(1, -1), shift.reshape(1, -1)


# ----------------------------- forward --------------------------------------------------

def expert_forward(x, params, *, tm=None):
    """x: (N, input_dim) float32.

    params: w1 (in,hid), w2 (hid,out) [transposed vs PyTorch], g1/be1 (hid,), g2/be2 (out,).
    Linear biases are intentionally absent: training-mode BatchNorm's batch-mean
    subtraction cancels any per-feature constant bias exactly.
    """
    n, in_dim = x.shape
    w1, g1, be1 = params["w1"], params["g1"], params["be1"]
    w2, g2, be2 = params["w2"], params["g2"], params["be2"]
    hid, out_dim = w1.shape[1], w2.shape[1]

    # Pad feature dims to 128 lanes, batch to a multiple of the row tile.
    kp = _round_up(in_dim, 128)
    hp = _round_up(hid, 128)
    op = _round_up(out_dim, 128)
    if tm is None:
        tm = _choose_tm(n)
    n_pad = _round_up(n, tm)
    n_tiles = n_pad // tm
    need_mask = n_pad != n

    x_p = _pad2d(x, n_pad, kp).astype(MATMUL_DTYPE)           # downcast fused with the pad copy
    w1_p = _pad2d(w1, kp, hp).astype(MATMUL_DTYPE)
    w2_p = _pad2d(w2, hp, op).astype(MATMUL_DTYPE)
    g1_p = jnp.pad(g1, (0, hp - hid))
    be1_p = jnp.pad(be1, (0, hp - hid))
    g2_p = jnp.pad(g2, (0, op - out_dim))
    be2_p = jnp.pad(be2, (0, op - out_dim))

    grid = (n_tiles,)
    cparams = pltpu.CompilerParams(
        dimension_semantics=("parallel",),   # independent N-tiles -> megacore-shardable
        vmem_limit_bytes=_vmem_limit_bytes(),
    )

    def weight_spec(shape):
        # Constant-index block: it is fetched once and never changes, so a single buffer
        # suffices (halves weight VMEM residency vs. the default double buffer).
        return pl.BlockSpec(shape, lambda i: (0, 0), pipeline_mode=pl.Buffered(1))

    def stats_out(f):
        shape = jax.ShapeDtypeStruct((n_tiles, 1, f), jnp.float32)
        spec = pl.BlockSpec((1, 1, f), lambda i: (i, 0, 0))
        return shape, spec

    # ---- pass 1: h_pre = x @ W1, partial BN1 stats ------------------------------------
    st1_shape, st1_spec = stats_out(hp)
    h_pre, s1, ss1 = pl.pallas_call(
        _matmul_stats_kernel,
        grid=grid,
        in_specs=[pl.BlockSpec((tm, kp), lambda i: (i, 0)),
                  weight_spec((kp, hp))],
        out_specs=[pl.BlockSpec((tm, hp), lambda i: (i, 0)), st1_spec, st1_spec],
        out_shape=[jax.ShapeDtypeStruct((n_pad, hp), MATMUL_DTYPE), st1_shape, st1_shape],
        compiler_params=cparams,
        cost_estimate=pl.CostEstimate(
            flops=2 * n_pad * kp * hp,
            transcendentals=0,
            bytes_accessed=2 * n_pad * kp + 2 * kp * hp + 2 * n_pad * hp + 8 * n_tiles * hp),
    )(x_p, w1_p)

    scale1, shift1 = _bn_scale_shift(s1, ss1, g1_p, be1_p, n)

    # ---- pass 2: y_pre = GELU(BN1(h_pre)) @ W2, partial BN2 stats ----------------------
    st2_shape, st2_spec = stats_out(op)
    y_pre, s2, ss2 = pl.pallas_call(
        _make_bn_gelu_matmul_stats_kernel(tm, n, need_mask),
        grid=grid,
        in_specs=[pl.BlockSpec((tm, hp), lambda i: (i, 0)),
                  pl.BlockSpec((1, hp), lambda i: (0, 0)),
                  pl.BlockSpec((1, hp), lambda i: (0, 0)),
                  weight_spec((hp, op))],
        out_specs=[pl.BlockSpec((tm, op), lambda i: (i, 0)), st2_spec, st2_spec],
        out_shape=[jax.ShapeDtypeStruct((n_pad, op), MATMUL_DTYPE), st2_shape, st2_shape],
        compiler_params=cparams,
        cost_estimate=pl.CostEstimate(
            flops=2 * n_pad * hp * op + 8 * n_pad * hp,
            transcendentals=n_pad * hp,
            bytes_accessed=2 * n_pad * hp + 2 * hp * op + 2 * n_pad * op + 8 * n_tiles * op),
    )(h_pre, scale1, shift1, w2_p)

    scale2, shift2 = _bn_scale_shift(s2, ss2, g2_p, be2_p, n)

    # ---- pass 3: out = GELU(BN2(y_pre)) ------------------------------------------------
    out_p = pl.pallas_call(
        _bn_gelu_kernel,
        grid=grid,
        in_specs=[pl.BlockSpec((tm, op), lambda i: (i, 0)),
                  pl.BlockSpec((1, op), lambda i: (0, 0)),
                  pl.BlockSpec((1, op), lambda i: (0, 0))],
        out_specs=pl.BlockSpec((tm, op), lambda i: (i, 0)),
        out_shape=jax.ShapeDtypeStruct((n_pad, op), jnp.float32),
        compiler_params=cparams,
        cost_estimate=pl.CostEstimate(
            flops=8 * n_pad * op,
            transcendentals=n_pad * op,
            bytes_accessed=2 * n_pad * op + 4 * n_pad * op),
    )(y_pre, scale2, shift2)

    if n_pad == n and op == out_dim:
        return out_p
    return out_p[:n, :out_dim]


def init_expert_params(key, input_dim, hidden_dim, output_dim):
    k1, k2 = jax.random.split(key, 2)
    # Deterministic small-scale synthetic init (not a checkpoint load). Linear biases are
    # omitted: they are exactly cancelled by training-mode BatchNorm mean subtraction.
    w1 = jax.random.normal(k1, (input_dim, hidden_dim), jnp.float32) * 0.1
    w2 = jax.random.normal(k2, (hidden_dim, output_dim), jnp.float32) * 0.1
    g1 = jnp.ones((hidden_dim,), jnp.float32)
    be1 = jnp.zeros((hidden_dim,), jnp.float32)
    g2 = jnp.ones((output_dim,), jnp.float32)
    be2 = jnp.zeros((output_dim,), jnp.float32)
    return dict(w1=w1, g1=g1, be1=be1, w2=w2, g2=g2, be2=be2)


if __name__ == "__main__":
    N, INPUT_DIM, HIDDEN_DIM, OUTPUT_DIM = 8, 16, 32, 8

    key = jax.random.PRNGKey(0)
    kx, kp = jax.random.split(key)
    x = jax.random.normal(kx, (N, INPUT_DIM), jnp.float32)
    params = init_expert_params(kp, INPUT_DIM, HIDDEN_DIM, OUTPUT_DIM)

    out = expert_forward(x, params)
    jax.block_until_ready(out)
    assert out.shape == (N, OUTPUT_DIM)
    assert out.dtype == jnp.float32
    assert bool(jnp.all(jnp.isfinite(out)))
    print("KERNEL_OK")
</pallas_src>

<mosaic_0001>
module attributes {stable_mosaic.version = 11 : i64} {
  func.func @_matmul_stats_kernel(%arg0: i32, %arg1: memref<8x128xbf16, #tpu.memory_space<vmem>>, %arg2: memref<128x128xbf16, #tpu.memory_space<vmem>>, %arg3: memref<8x128xbf16, #tpu.memory_space<vmem>>, %arg4: memref<1x1x128xf32, #tpu.memory_space<vmem>>, %arg5: memref<1x1x128xf32, #tpu.memory_space<vmem>>) attributes {dimension_semantics = [#tpu.dimension_semantics<parallel>], iteration_bounds = array<i64: 1>, scalar_prefetch = 0 : i64, scratch_operands = 0 : i64, tpu.core_type = #tpu.core_type<tc>, window_params = [{transform_indices = @transform_0, window_bounds = array<i64: 8, 128>}, {pipeline_mode = #tpu.pipeline_mode<synchronous>, transform_indices = @transform_1, window_bounds = array<i64: 128, 128>}, {transform_indices = @transform_2, window_bounds = array<i64: 8, 128>}, {transform_indices = @transform_3, window_bounds = array<i64: 1, 1, 128>}, {transform_indices = @transform_4, window_bounds = array<i64: 1, 1, 128>}]} {
    %c0 = arith.constant 0 : index
    %c0_0 = arith.constant 0 : index
    %0 = vector.load %arg1[%c0, %c0_0] : memref<8x128xbf16, #tpu.memory_space<vmem>>, vector<8x128xbf16>
    %c0_1 = arith.constant 0 : index
    %c0_2 = arith.constant 0 : index
    %1 = vector.load %arg2[%c0_1, %c0_2] : memref<128x128xbf16, #tpu.memory_space<vmem>>, vector<128x128xbf16>
    %cst = arith.constant dense<0.000000e+00> : vector<8x128xf32>
    %2 = tpu.matmul %0, %1, %cst {dimension_numbers = #tpu.dot_dimension_numbers<[1], [0], [0], [1], [0, 0, 1, 1], [], []>} : vector<8x128xbf16>, vector<128x128xbf16>, vector<8x128xf32> -> vector<8x128xf32>
    %3 = arith.truncf %2 : vector<8x128xf32> to vector<8x128xbf16>
    %c0_3 = arith.constant 0 : index
    %c0_4 = arith.constant 0 : index
    %4 = vector.load %arg3[%c0_3, %c0_4] : memref<8x128xbf16, #tpu.memory_space<vmem>>, vector<8x128xbf16>
    tpu.vector_store %arg3[%c0_3, %c0_4], %3 {strides = array<i32>} : memref<8x128xbf16, #tpu.memory_space<vmem>>, vector<8x128xbf16>,
    %cst_5 = arith.constant dense<0.000000e+00> : vector<128xf32>
    %5 = vector.multi_reduction <add>, %2, %cst_5 [0] : vector<8x128xf32> to vector<128xf32>
    %6 = vector.shape_cast %5 : vector<128xf32> to vector<1x128xf32>
    %7 = vector.shape_cast %6 : vector<1x128xf32> to vector<1x1x128xf32>
    %c0_6 = arith.constant 0 : index
    %c0_7 = arith.constant 0 : index
    %c0_8 = arith.constant 0 : index
    %8 = vector.load %arg4[%c0_6, %c0_7, %c0_8] : memref<1x1x128xf32, #tpu.memory_space<vmem>>, vector<1x1x128xf32>
    tpu.vector_store %arg4[%c0_6, %c0_7, %c0_8], %7 {strides = array<i32>} : memref<1x1x128xf32, #tpu.memory_space<vmem>>, vector<1x1x128xf32>,
    %9 = arith.mulf %2, %2 : vector<8x128xf32>
    %cst_9 = arith.constant dense<0.000000e+00> : vector<128xf32>
    %10 = vector.multi_reduction <add>, %9, %cst_9 [0] : vector<8x128xf32> to vector<128xf32>
    %11 = vector.shape_cast %10 : vector<128xf32> to vector<1x128xf32>
    %12 = vector.shape_cast %11 : vector<1x128xf32> to vector<1x1x128xf32>
    %c0_10 = arith.constant 0 : index
    %c0_11 = arith.constant 0 : index
    %c0_12 = arith.constant 0 : index
    %13 = vector.load %arg5[%c0_10, %c0_11, %c0_12] : memref<1x1x128xf32, #tpu.memory_space<vmem>>, vector<1x1x128xf32>
    tpu.vector_store %arg5[%c0_10, %c0_11, %c0_12], %12 {strides = array<i32>} : memref<1x1x128xf32, #tpu.memory_space<vmem>>, vector<1x1x128xf32>,
    return
  }
  func.func @transform_0(%arg0: i32) -> (i32, i32) {
    %c0_i32 = arith.constant 0 : i32
    %c0_i32_0 = arith.constant 0 : i32
    return %arg0, %c0_i32 : i32, i32
  }
  func.func @transform_1(%arg0: i32) -> (i32, i32) {
    %c0_i32 = arith.constant 0 : i32
    %c0_i32_0 = arith.constant 0 : i32
    %c0_i32_1 = arith.constant 0 : i32
    return %c0_i32, %c0_i32_0 : i32, i32
  }
  func.func @transform_2(%arg0: i32) -> (i32, i32) {
    %c0_i32 = arith.constant 0 : i32
    %c0_i32_0 = arith.constant 0 : i32
    return %arg0, %c0_i32 : i32, i32
  }
  func.func @transform_3(%arg0: i32) -> (i32, i32, i32) {
    %c0_i32 = arith.constant 0 : i32
    %c0_i32_0 = arith.constant 0 : i32
    %c0_i32_1 = arith.constant 0 : i32
    return %arg0, %c0_i32, %c0_i32_0 : i32, i32, i32
  }
  func.func @transform_4(%arg0: i32) -> (i32, i32, i32) {
    %c0_i32 = arith.constant 0 : i32
    %c0_i32_0 = arith.constant 0 : i32
    %c0_i32_1 = arith.constant 0 : i32
    return %arg0, %c0_i32, %c0_i32_0 : i32, i32, i32
  }
}

</mosaic_0001>

<bundles_post_ra>
// kernel: tpu_custom_call.1
= control target key start
LH: loop header
LB: loop body
LE: loop exit
PB: predicated region body
PF: predicated region fallthrough
CT: control target
= control target key end

     0   :  { %10 = vsyncpa [#allocation3], 0  ;;  %s489_s0 = inlined_call_operand.hbm [shape: bf16[8,128], index: 0, kind: input, shape index: {}]   ;;  %s490_s1 = inlined_call_operand.hbm [shape: bf16[128,128], index: 1, kind: input, shape index: {}]   ;;  %s491_s2 = inlined_call_operand.hbm [shape: bf16[8,128], index: 2, kind: output, shape index: {0}]   ;;  %s492_s3 = inlined_call_operand.hbm [shape: f32[1,1,128], index: 3, kind: output, shape index: {1}]   ;;  %s493_s4 = inlined_call_operand.hbm [shape: f32[1,1,128], index: 4, kind: output, shape index: {2}]  }
   0x1   :  { %11 = vsyncpa [#allocation6], 0 }
   0x2   :  { %12 = vsyncpa [#allocation4], 0 }
   0x3   :  { %13 = vsyncpa [#allocation9], 0  ;;  %s380_s15 = smov [#allocation2]   ;;  %s381_s17 = smov [#allocation5]  }
   0x4   :  { %s20_s16 = sshll.u32 %s380_s15, 4  ;;  %s29_s18 = sshll.u32 %s381_s17, 4  ;;  %s21_s16 = int_to_ptr.vmem [resolvable:$true] %s20_s16  ;;  %s414_s18 = int_to_ptr.vmem [resolvable:$true] %s29_s18 }
   0x5   :  { %s262_s21 = scalar_lea.hbm %s489_s0, 64 }
   0x6   :  { %p263_p0 = scmp.ne.s32.totalorder %s489_s0, %s262_s21  ;;  %p266_p1 = scmp.lt.u32.totalorder %s262_s21, %s489_s0 }
   0x8   :  { %p268_p2 = pnand %p266_p1, %p263_p0 }
   0xa   :  { %271 = shalt.err (!%p268_p2)
}
   0xb   :  { %s272_s26 = scalar_lea.vmem %s21_s16, 64  ;;  %p277_p4 = scmp.lt.s32.totalorder %s21_s16, %s21_s16 }
   0xc   :  { %p273_p3 = scmp.ne.s32.totalorder %s21_s16, %s272_s26  ;;  %p278_p5 = scmp.lt.s32.totalorder %s272_s26, %s272_s26 }
   0xe   :  { %p279_p6 = por %p278_p5, %p277_p4 }
  0x10   :  { %p280_p7 = pnand %p279_p6, %p273_p3 }
  0x12   :  { %283 = shalt.err (!%p280_p7)
}
  0x13   :  { %23 = dma.hbm_to_vmem [thread:$0]  %s489_s0, 64, %s21_s16, [#allocation3]  }
  0x14   :  { %s284_s5 = scalar_lea.hbm %s490_s1, 1024 }
  0x15   :  { %p285_p8 = scmp.ne.s32.totalorder %s490_s1, %s284_s5  ;;  %p288_p9 = scmp.lt.u32.totalorder %s284_s5, %s490_s1 }
  0x17   :  { %p290_p10 = pnand %p288_p9, %p285_p8 }
  0x19   :  { %293 = shalt.err (!%p290_p10)
}
  0x1a   :  { %s294_s10 = scalar_lea.vmem %s414_s18, 1024  ;;  %p299_p12 = scmp.lt.s32.totalorder %s414_s18, %s414_s18 }
  0x1b   :  { %p295_p11 = scmp.ne.s32.totalorder %s414_s18, %s294_s10  ;;  %p300_p13 = scmp.lt.s32.totalorder %s294_s10, %s294_s10 }
  0x1d   :  { %p301_p0 = por %p300_p13, %p299_p12 }
  0x1f   :  { %p302_p1 = pnand %p301_p0, %p295_p11 }
  0x21   :  { %305 = shalt.err (!%p302_p1)
}
  0x22   :  { %s382_s0 = smov 64   ;;  %s383_s11 = smov 4  }
  0x23   :  { %35 = dma.hbm_to_vmem [thread:$0]  %s490_s1, 1024, %s414_s18, [#allocation6], %s382_s0, %s382_s0, %s383_s11  }
  0x24   :  { %372 = dma.done.wait [#allocation3], 64  }
  0x25   :  { %373 = vsyncadd [#allocation3], 4294967232 }
  0x26   :  { %374 = dma.done.wait [#allocation6], 1024  }
  0x27   :  { %375 = vsyncadd [#allocation6], 4294966272  ;;  %v384_v0 = vmov 0.0   ;;  %vm385_vm0 = vmmov 0   ;;  %v254_v1 = vld [vmem:[#allocation5] sm:$0xff]   ;;  %v255_v2 = vld [vmem:[#allocation5 + $0x8] sm:$0xff]  }
  0x28   :  { %225 = vmatprep.subr.bf16.mxu0 %v384_v0  ;;  %241 = vmatprep.mubr.msk.bf16.mxu0 %vm385_vm0, %v384_v0  ;;  %v256_v3 = vld [vmem:[#allocation5 + $0x10] sm:$0xff]   ;;  %v257_v4 = vld [vmem:[#allocation5 + $0x18] sm:$0xff]   ;;  %v258_v5 = vld [vmem:[#allocation5 + $0x20] sm:$0xff]   ;;  %s386_s1 = smov [#allocation7]  }
  0x29   :  { %226 = vmatpush3.bf16.msra.mxu0 %v254_v1  ;;  %v259_v6 = vld [vmem:[#allocation5 + $0x28] sm:$0xff]   ;;  %v260_v7 = vld [vmem:[#allocation5 + $0x30] sm:$0xff]   ;;  %v261_v8 = vld [vmem:[#allocation5 + $0x38] sm:$0xff]   ;;  %s171_s14 = sshll.u32 %s386_s1, 4  ;;  %s172_s14 = int_to_ptr.vmem [resolvable:$true] %s171_s14 }
  0x2a   :  { %227 = vmatprep.subr.bf16.mxu0 %v384_v0  ;;  %v43_v9 = vld [vmem:[#allocation2] sm:$0xf]  ;;  %s306_s15 = scalar_lea.vmem %s172_s14, 64  ;;  %p311_p3 = scmp.lt.s32.totalorder %s172_s14, %s172_s14 }
  0x2b   :  { %p307_p2 = scmp.ne.s32.totalorder %s172_s14, %s306_s15  ;;  %p312_p4 = scmp.lt.s32.totalorder %s306_s15, %s306_s15 }
  0x2d   :  { %228 = vmatpush3.bf16.msra.mxu0 %v255_v2  ;;  %p313_p5 = por %p312_p4, %p311_p3 }
  0x2e   :  { %229 = vmatprep.subr.bf16.mxu0 %v384_v0 }
  0x2f   :  { %p314_p6 = pnand %p313_p5, %p307_p2 }
  0x31   :  { %230 = vmatpush3.bf16.msra.mxu0 %v256_v3 }
  0x32   :  { %231 = vmatprep.subr.bf16.mxu0 %v384_v0 }
  0x35   :  { %232 = vmatpush3.bf16.msra.mxu0 %v257_v4 }
  0x36   :  { %233 = vmatprep.subr.bf16.mxu0 %v384_v0 }
  0x39   :  { %234 = vmatpush3.bf16.msra.mxu0 %v258_v5 }
  0x3a   :  { %235 = vmatprep.subr.bf16.mxu0 %v384_v0 }
  0x3d   :  { %236 = vmatpush3.bf16.msra.mxu0 %v259_v6 }
  0x3e   :  { %237 = vmatprep.subr.bf16.mxu0 %v384_v0 }
  0x41   :  { %238 = vmatpush3.bf16.msra.mxu0 %v260_v7 }
  0x42   :  { %239 = vmatprep.subr.bf16.mxu0 %v384_v0 }
  0x45   :  { %240 = vmatpush3.bf16.msra.mxu0 %v261_v8 }
  0x48   :  { %242 = vmatmul.mubr.bf16.vlgmr.msra.gmra.mrb[0].mxu0 %v43_v9 }
 0x11b   :  { %v142_v10 = vpop.f32.mrb[0].mxu0 }
 0x11c   :  { %v150_v11 = vrot.slane %v142_v10, 4  ;;  %v157_v12 = vmul.f32 %v142_v10, %v142_v10  ;;  %v243_v13 = vpop.f32.mrb[1].mxu0  ;;  %v148_v14 = vpack.c.bf16 %v142_v10, %v142_v10 }
 0x11d   :  { %v145_v15 = vpop.f32.mrb[2].mxu0 }
 0x11e   :  { %v151_v16 = vadd.f32 %v150_v11, %v142_v10  ;;  %v158_v17 = vrot.slane %v157_v12, 4  ;;  %v244_v18 = vpop.f32.mrb[3].mxu0  ;;  %149 = vst [vmem:[#allocation7] sm:$0xf] %v148_v14 }
 0x11f   :  { %317 = shalt.err (!%p314_p6)
}
 0x120   :  { %s318_s18 = scalar_lea.hbm %s491_s2, 64 }
 0x121   :  { %p319_p7 = scmp.ne.s32.totalorder %s491_s2, %s318_s18  ;;  %p322_p8 = scmp.lt.u32.totalorder %s318_s18, %s491_s2 }
 0x123   :  { %p324_p9 = pnand %p322_p8, %p319_p7 }
 0x125   :  { %327 = shalt.err (!%p324_p9)
}
 0x126   :  { %174 = dma.vmem_to_hbm [thread:$0]  %s172_s14, 64, %s491_s2, [#allocation4]   ;;  %v159_v19 = vadd.f32 %v158_v17, %v157_v12  ;;  %v152_v20 = vrot.slane %v151_v16, 2 }
 0x127   :  { %s387_s25 = smov [#allocation8]   ;;  %s388_s27 = smov [#allocation10]  }
 0x128   :  { %v153_v21 = vadd.f32 %v152_v20, %v151_v16  ;;  %v160_v22 = vrot.slane %v159_v19, 2  ;;  %s181_s26 = sshll.u32 %s387_s25, 4  ;;  %s191_s28 = sshll.u32 %s388_s27, 4  ;;  %s182_s26 = int_to_ptr.vmem [resolvable:$true] %s181_s26  ;;  %s457_s28 = int_to_ptr.vmem [resolvable:$true] %s191_s28 }
 0x129   :  { %s328_s29 = scalar_lea.vmem %s182_s26, 16  ;;  %s332_s2 = scalar_lea.vmem %s182_s26, 32 }
 0x12a   :  { %v154_v23 = vrot.slane %v153_v21, 1  ;;  %v161_v24 = vadd.f32 %v160_v22, %v159_v19  ;;  %p329_p10 = scmp.ne.s32.totalorder %s182_s26, %s328_s29  ;;  %p333_p11 = scmp.lt.s32.totalorder %s182_s26, %s182_s26 }
 0x12b   :  { %p334_p12 = scmp.lt.s32.totalorder %s332_s2, %s328_s29 }
 0x12c   :  { %v155_v25 = vadd.f32 %v154_v23, %v153_v21  ;;  %v162_v26 = vrot.slane %v161_v24, 1 }
 0x12d   :  { %p335_p13 = por %p334_p12, %p333_p11 }
 0x12e   :  { %156 = vst [vmem:[#allocation8] sm:$0x1] %v155_v25  ;;  %v163_v27 = vadd.f32 %v162_v26, %v161_v24 }
 0x12f   :  { %p336_p0 = pnand %p335_p13, %p329_p10 }
 0x131   :  { %339 = shalt.err (!%p336_p0)
}
 0x132   :  { %s340_s6 = scalar_lea.hbm %s492_s3, 16 }
 0x133   :  { %p341_p1 = scmp.ne.s32.totalorder %s492_s3, %s340_s6  ;;  %p344_p2 = scmp.lt.u32.totalorder %s340_s6, %s492_s3 }
 0x135   :  { %p346_p3 = pnand %p344_p2, %p341_p1 }
 0x137   :  { %349 = shalt.err (!%p346_p3)
}
 0x138   :  { %184 = dma.vmem_to_hbm [thread:$0]  %s182_s26, 16, %s492_s3, [#allocation9]   ;;  %164 = vst [vmem:[#allocation10] sm:$0x1] %v163_v27 }
 0x139   :  { %s350_s12 = scalar_lea.vmem %s457_s28, 16  ;;  %s354_s13 = scalar_lea.vmem %s457_s28, 32 }
 0x13a   :  { %p351_p4 = scmp.ne.s32.totalorder %s457_s28, %s350_s12  ;;  %p355_p5 = scmp.lt.s32.totalorder %s457_s28, %s457_s28 }
 0x13b   :  { %p356_p6 = scmp.lt.s32.totalorder %s354_s13, %s350_s12 }
 0x13d   :  { %p357_p7 = por %p356_p6, %p355_p5 }
 0x13f   :  { %p358_p8 = pnand %p357_p7, %p351_p4 }
 0x141   :  { %361 = shalt.err (!%p358_p8)
}
 0x142   :  { %s362_s15 = scalar_lea.hbm %s493_s4, 16 }
 0x143   :  { %p363_p9 = scmp.ne.s32.totalorder %s493_s4, %s362_s15  ;;  %p366_p10 = scmp.lt.u32.totalorder %s362_s15, %s493_s4 }
 0x145   :  { %p368_p11 = pnand %p366_p10, %p363_p9 }
 0x147   :  { %371 = shalt.err (!%p368_p11)
}
 0x148   :  { %194 = dma.vmem_to_hbm [thread:$0]  %s457_s28, 16, %s493_s4, [#allocation9]  }
 0x149   :  { %376 = dma.done.wait [#allocation4], 64  }
 0x14a   :  { %377 = vsyncadd [#allocation4], 4294967232 }
 0x14b   :  { %378 = dma.done.wait [#allocation9], 32  }
 0x14c   :  { %379 = vsyncadd [#allocation9], 4294967264 }
 0x14d   :  { %204 = vsyncpa [#allocation3], 1 }
 0x14e   :  { %205 = vsyncpa [#allocation6], 1 }
 0x14f   :  { %206 = vsyncpa [#allocation4], 1 }
 0x150   :  { %207 = vsyncpa [#allocation9], 1 }

</bundles_post_ra>
